<compile_context>
chip_gen: v5e
topology: v5e:2x2
jax: 0.10.0
libtpu: 0.0.40
codegen_flags: <defaults>
</compile_context>

<pallas_src>
import jax
import jax.numpy as jnp
from jax.experimental import pallas as pl
from jax.experimental.pallas import tpu as pltpu

# Edge index copied verbatim from the PyTorch module.  (Note: src == dst for
# every edge in this module, so the graph degenerates to weighted self-loops;
# the kernel implements general GraphConv aggregation regardless.)
EDGE_INDEX = [
    [1, 0, 3, 0, 4, 0, 2, 1, 4, 1, 4, 3, 6, 3, 5, 4,
     7, 4, 7, 6, 8, 7, 4, 2, 6, 4, 4, 5, 8, 4],
    [1, 0, 3, 0, 4, 0, 2, 1, 4, 1, 4, 3, 6, 3, 5, 4,
     7, 4, 7, 6, 8, 7, 4, 2, 6, 4, 4, 5, 8, 4],
]
NUM_NODES = 9

N_PAD = 16       # per-graph node slot (multiple of 16 for bf16 sublane packing)
C_IN_PAD = 128   # input-channel dim padded to a full lane tile
C_OUT_PAD = 128  # output-channel dim padded to a full lane tile (lane-dense stores)


def _gnn_kernel(a_ref, x_ref, w_rel_ref, w_root_ref, b_ref, o_ref, xp_ref):
    """G graphs per grid step: pad+cast, block-diag aggregation, projection, bias, ReLU."""
    g, n_nodes, c_in = x_ref.shape
    m = g * N_PAD

    # Fold the zero-pad + bf16 cast into the kernel: write the raw (G, 9, C_in)
    # f32 block into a zeroed (G, 16, 128) scratch tile.  Zeroed every step
    # (cheap vs the matmuls, and safe under megacore grid splitting).
    xp_ref[...] = jnp.zeros_like(xp_ref)
    xp_ref[:, :n_nodes, :c_in] = x_ref[...]
    x_pad = xp_ref[...].reshape(m, C_IN_PAD).astype(jnp.bfloat16)          # (M, 128)

    # Message passing: scatter-add over neighbors == block-diagonal A @ X.
    agg = jnp.dot(a_ref[...], x_pad, preferred_element_type=jnp.float32)   # (M, 128) f32

    # Projection: two accumulating K=128 MXU matmuls (no concat temp).
    h = jnp.dot(agg.astype(jnp.bfloat16), w_rel_ref[...],
                preferred_element_type=jnp.float32)
    h = h + jnp.dot(x_pad, w_root_ref[...], preferred_element_type=jnp.float32)

    # Epilogue in f32: bias + ReLU, then lane-dense store.
    h = jnp.maximum(h + b_ref[...], 0.0)
    o_ref[...] = h.reshape(g, N_PAD, C_OUT_PAD).astype(o_ref.dtype)


def build_adjacency(edge_index, num_nodes, dtype=jnp.float32):
    """Dense aggregation matrix: A[dst, src] += 1 for every edge (plain-JAX glue)."""
    src = jnp.asarray(edge_index[0], dtype=jnp.int32)
    dst = jnp.asarray(edge_index[1], dtype=jnp.int32)
    a = jnp.zeros((num_nodes, num_nodes), dtype=dtype)
    return a.at[dst, src].add(1.0)


def _pick_group(batch):
    """Graphs per grid step: fill the MXU M dim (G*16 -> 128/256) while keeping
    >= 2 grid steps whenever batch >= 2 so both v7x TensorCores stay busy."""
    for g in (16, 8, 4, 2):
        if batch >= 2 * g:
            return g
    return 1


def make_gnn_layer(edge_index, num_nodes, w_rel, w_root, b_rel,
                   out_dtype=jnp.float32):
    """Returns a jitted forward over a batch of graphs sharing one edge_index.

    Graph-constant prep (padded adjacency, padded bf16 weights, bias) is done
    once here and captured in the closure — not per call.
    """
    c_in, c_out = w_rel.shape
    assert num_nodes <= N_PAD and c_in <= C_IN_PAD and c_out <= C_OUT_PAD

    adj = build_adjacency(edge_index, num_nodes)                        # (N, N), small ints
    adj_p = jnp.zeros((N_PAD, N_PAD), jnp.float32)
    adj_p = adj_p.at[:num_nodes, :num_nodes].set(adj)

    w_rel_p = jnp.zeros((C_IN_PAD, C_OUT_PAD), jnp.bfloat16)
    w_rel_p = w_rel_p.at[:c_in, :c_out].set(w_rel.astype(jnp.bfloat16))
    w_root_p = jnp.zeros((C_IN_PAD, C_OUT_PAD), jnp.bfloat16)
    w_root_p = w_root_p.at[:c_in, :c_out].set(w_root.astype(jnp.bfloat16))
    b_p = jnp.zeros((1, C_OUT_PAD), jnp.float32).at[0, :c_out].set(b_rel)

    @jax.jit
    def forward(x_batch):                                               # (B, N, C_in) f32
        batch = x_batch.shape[0]
        g = _pick_group(batch)
        n_steps = pl.cdiv(batch, g)
        b_pad = n_steps * g
        m = g * N_PAD

        if b_pad != batch:
            x_batch = jnp.concatenate(
                [x_batch,
                 jnp.zeros((b_pad - batch,) + x_batch.shape[1:], x_batch.dtype)],
                axis=0)

        # Block-diagonal aggregation matrix for one G-graph group.  Counts are
        # small exact integers -> exact in bf16.
        a_blk = jnp.kron(jnp.eye(g, dtype=jnp.float32), adj_p).astype(jnp.bfloat16)

        out = pl.pallas_call(
            _gnn_kernel,
            out_shape=jax.ShapeDtypeStruct((b_pad, N_PAD, C_OUT_PAD), out_dtype),
            grid=(n_steps,),
            in_specs=[
                pl.BlockSpec((m, m), lambda i: (0, 0)),                   # shared block-diag A
                pl.BlockSpec((g, num_nodes, c_in), lambda i: (i, 0, 0)),  # raw per-group X
                pl.BlockSpec((C_IN_PAD, C_OUT_PAD), lambda i: (0, 0)),    # shared W_rel
                pl.BlockSpec((C_IN_PAD, C_OUT_PAD), lambda i: (0, 0)),    # shared W_root
                pl.BlockSpec((1, C_OUT_PAD), lambda i: (0, 0)),           # shared bias
            ],
            out_specs=pl.BlockSpec((g, N_PAD, C_OUT_PAD), lambda i: (i, 0, 0)),
            scratch_shapes=[pltpu.VMEM((g, N_PAD, C_IN_PAD), jnp.float32)],
            compiler_params=pltpu.CompilerParams(
                dimension_semantics=("parallel",),   # grid steps -> both v7x TCs
            ),
        )(a_blk, x_batch, w_rel_p, w_root_p, b_p)
        return out[:batch, :num_nodes, :c_out]

    return forward


def init_params(key, in_channels, hidden_channels):
    """Deterministic synthetic params matching GraphConv(in, hidden):
    lin_rel: Linear(in, hidden, bias=True); lin_root: Linear(in, hidden, bias=False).
    Stored transposed as [in, hidden] for x @ W."""
    k1, k2, k3 = jax.random.split(key, 3)
    scale = 1.0 / jnp.sqrt(jnp.float32(in_channels))
    w_rel = jax.random.uniform(k1, (in_channels, hidden_channels), jnp.float32,
                               minval=-scale, maxval=scale)
    w_root = jax.random.uniform(k2, (in_channels, hidden_channels), jnp.float32,
                                minval=-scale, maxval=scale)
    b_rel = jax.random.uniform(k3, (hidden_channels,), jnp.float32,
                               minval=-scale, maxval=scale)
    return w_rel, w_root, b_rel


if __name__ == "__main__":
    in_channels = 4
    hidden_channels = 32
    batch = 16   # -> G=8 graphs/step (M=128), 2 parallel grid steps
    # out_channels of the PyTorch module is unused by its forward.

    key = jax.random.PRNGKey(0)
    k_x, k_p = jax.random.split(key)
    x_batch = jax.random.normal(k_x, (batch, NUM_NODES, in_channels), jnp.float32)
    w_rel, w_root, b_rel = init_params(k_p, in_channels, hidden_channels)

    forward = make_gnn_layer(EDGE_INDEX, NUM_NODES, w_rel, w_root, b_rel)
    out = jax.block_until_ready(forward(x_batch))
    assert out.shape == (batch, NUM_NODES, hidden_channels)

    # Pure-JAX reference of GraphConv + ReLU, emulating the kernel's bf16 operand rounding.
    adj = build_adjacency(EDGE_INDEX, NUM_NODES)
    a_bf = adj.astype(jnp.bfloat16).astype(jnp.float32)
    x_bf = x_batch.astype(jnp.bfloat16).astype(jnp.float32)
    w_rel_bf = w_rel.astype(jnp.bfloat16).astype(jnp.float32)
    w_root_bf = w_root.astype(jnp.bfloat16).astype(jnp.float32)
    agg = jnp.einsum("nm,bmc->bnc", a_bf, x_bf).astype(jnp.bfloat16).astype(jnp.float32)
    ref = jnp.maximum(agg @ w_rel_bf + x_bf @ w_root_bf + b_rel[None, None, :], 0.0)
    assert jnp.allclose(out, ref, atol=1e-2, rtol=1e-2), "mismatch vs reference"

    # Single-graph semantics (matches the PyTorch module forward(x)): x -> forward(x[None])[0].
    single = jax.block_until_ready(forward(x_batch[:1]))[0]
    assert jnp.allclose(single, out[0], atol=1e-5, rtol=1e-5)

    print("KERNEL_OK")
</pallas_src>

<mosaic_0001>
module attributes {stable_mosaic.version = 11 : i64} {
  func.func @_gnn_kernel(%arg0: i32, %arg1: memref<128x128xbf16, #tpu.memory_space<vmem>>, %arg2: memref<8x9x4xf32, #tpu.memory_space<vmem>>, %arg3: memref<128x128xbf16, #tpu.memory_space<vmem>>, %arg4: memref<128x128xbf16, #tpu.memory_space<vmem>>, %arg5: memref<1x128xf32, #tpu.memory_space<vmem>>, %arg6: memref<8x16x128xf32, #tpu.memory_space<vmem>>, %arg7: memref<8x16x128xf32, #tpu.memory_space<vmem>>) attributes {dimension_semantics = [#tpu.dimension_semantics<parallel>], iteration_bounds = array<i64: 2>, scalar_prefetch = 0 : i64, scratch_operands = 1 : i64, tpu.core_type = #tpu.core_type<tc>, window_params = [{pipeline_mode = #tpu.pipeline_mode<synchronous>, transform_indices = @transform_0, window_bounds = array<i64: 128, 128>}, {transform_indices = @transform_1, window_bounds = array<i64: 8, 9, 4>}, {pipeline_mode = #tpu.pipeline_mode<synchronous>, transform_indices = @transform_2, window_bounds = array<i64: 128, 128>}, {pipeline_mode = #tpu.pipeline_mode<synchronous>, transform_indices = @transform_3, window_bounds = array<i64: 128, 128>}, {pipeline_mode = #tpu.pipeline_mode<synchronous>, transform_indices = @transform_4, window_bounds = array<i64: 1, 128>}, {transform_indices = @transform_5, window_bounds = array<i64: 8, 16, 128>}]} {
    %cst = arith.constant 0.000000e+00 : f32
    %0 = vector.broadcast %cst : f32 to vector<8x16x128xf32>
    %c0 = arith.constant 0 : index
    %c0_0 = arith.constant 0 : index
    %c0_1 = arith.constant 0 : index
    %1 = vector.load %arg7[%c0, %c0_0, %c0_1] : memref<8x16x128xf32, #tpu.memory_space<vmem>>, vector<8x16x128xf32>
    tpu.vector_store %arg7[%c0, %c0_0, %c0_1], %0 {strides = array<i32>} : memref<8x16x128xf32, #tpu.memory_space<vmem>>, vector<8x16x128xf32>,
    %c0_2 = arith.constant 0 : index
    %c0_3 = arith.constant 0 : index
    %c0_4 = arith.constant 0 : index
    %2 = vector.load %arg2[%c0_2, %c0_3, %c0_4] : memref<8x9x4xf32, #tpu.memory_space<vmem>>, vector<8x9x4xf32>
    %c0_5 = arith.constant 0 : index
    %c0_6 = arith.constant 0 : index
    %c0_7 = arith.constant 0 : index
    %3 = vector.load %arg7[%c0_5, %c0_6, %c0_7] : memref<8x16x128xf32, #tpu.memory_space<vmem>>, vector<8x9x4xf32>
    tpu.vector_store %arg7[%c0_5, %c0_6, %c0_7], %2 {strides = array<i32>} : memref<8x16x128xf32, #tpu.memory_space<vmem>>, vector<8x9x4xf32>,
    %c0_8 = arith.constant 0 : index
    %c0_9 = arith.constant 0 : index
    %c0_10 = arith.constant 0 : index
    %4 = vector.load %arg7[%c0_8, %c0_9, %c0_10] : memref<8x16x128xf32, #tpu.memory_space<vmem>>, vector<8x16x128xf32>
    %5 = vector.shape_cast %4 : vector<8x16x128xf32> to vector<128x128xf32>
    %6 = arith.truncf %5 : vector<128x128xf32> to vector<128x128xbf16>
    %c0_11 = arith.constant 0 : index
    %c0_12 = arith.constant 0 : index
    %7 = vector.load %arg1[%c0_11, %c0_12] : memref<128x128xbf16, #tpu.memory_space<vmem>>, vector<128x128xbf16>
    %cst_13 = arith.constant dense<0.000000e+00> : vector<128x128xf32>
    %8 = tpu.matmul %7, %6, %cst_13 {dimension_numbers = #tpu.dot_dimension_numbers<[1], [0], [0], [1], [0, 0, 1, 1], [], []>} : vector<128x128xbf16>, vector<128x128xbf16>, vector<128x128xf32> -> vector<128x128xf32>
    %9 = arith.truncf %8 : vector<128x128xf32> to vector<128x128xbf16>
    %c0_14 = arith.constant 0 : index
    %c0_15 = arith.constant 0 : index
    %10 = vector.load %arg3[%c0_14, %c0_15] : memref<128x128xbf16, #tpu.memory_space<vmem>>, vector<128x128xbf16>
    %cst_16 = arith.constant dense<0.000000e+00> : vector<128x128xf32>
    %11 = tpu.matmul %9, %10, %cst_16 {dimension_numbers = #tpu.dot_dimension_numbers<[1], [0], [0], [1], [0, 0, 1, 1], [], []>} : vector<128x128xbf16>, vector<128x128xbf16>, vector<128x128xf32> -> vector<128x128xf32>
    %c0_17 = arith.constant 0 : index
    %c0_18 = arith.constant 0 : index
    %12 = vector.load %arg4[%c0_17, %c0_18] : memref<128x128xbf16, #tpu.memory_space<vmem>>, vector<128x128xbf16>
    %cst_19 = arith.constant dense<0.000000e+00> : vector<128x128xf32>
    %13 = tpu.matmul %6, %12, %cst_19 {dimension_numbers = #tpu.dot_dimension_numbers<[1], [0], [0], [1], [0, 0, 1, 1], [], []>} : vector<128x128xbf16>, vector<128x128xbf16>, vector<128x128xf32> -> vector<128x128xf32>
    %14 = arith.addf %11, %13 : vector<128x128xf32>
    %c0_20 = arith.constant 0 : index
    %c0_21 = arith.constant 0 : index
    %15 = vector.load %arg5[%c0_20, %c0_21] : memref<1x128xf32, #tpu.memory_space<vmem>>, vector<1x128xf32>
    %16 = vector.broadcast %15 : vector<1x128xf32> to vector<128x128xf32>
    %17 = arith.addf %14, %16 : vector<128x128xf32>
    %cst_22 = arith.constant 0.000000e+00 : f32
    %18 = vector.broadcast %cst_22 : f32 to vector<128x128xf32>
    %19 = arith.maximumf %17, %18 : vector<128x128xf32>
    %20 = vector.shape_cast %19 : vector<128x128xf32> to vector<8x16x128xf32>
    %c0_23 = arith.constant 0 : index
    %c0_24 = arith.constant 0 : index
    %c0_25 = arith.constant 0 : index
    %21 = vector.load %arg6[%c0_23, %c0_24, %c0_25] : memref<8x16x128xf32, #tpu.memory_space<vmem>>, vector<8x16x128xf32>
    tpu.vector_store %arg6[%c0_23, %c0_24, %c0_25], %20 {strides = array<i32>} : memref<8x16x128xf32, #tpu.memory_space<vmem>>, vector<8x16x128xf32>,
    return
  }
  func.func @transform_0(%arg0: i32) -> (i32, i32) {
    %c0_i32 = arith.constant 0 : i32
    %c0_i32_0 = arith.constant 0 : i32
    %c0_i32_1 = arith.constant 0 : i32
    return %c0_i32, %c0_i32_0 : i32, i32
  }
  func.func @transform_1(%arg0: i32) -> (i32, i32, i32) {
    %c0_i32 = arith.constant 0 : i32
    %c0_i32_0 = arith.constant 0 : i32
    %c0_i32_1 = arith.constant 0 : i32
    return %arg0, %c0_i32, %c0_i32_0 : i32, i32, i32
  }
  func.func @transform_2(%arg0: i32) -> (i32, i32) {
    %c0_i32 = arith.constant 0 : i32
    %c0_i32_0 = arith.constant 0 : i32
    %c0_i32_1 = arith.constant 0 : i32
    return %c0_i32, %c0_i32_0 : i32, i32
  }
  func.func @transform_3(%arg0: i32) -> (i32, i32) {
    %c0_i32 = arith.constant 0 : i32
    %c0_i32_0 = arith.constant 0 : i32
    %c0_i32_1 = arith.constant 0 : i32
    return %c0_i32, %c0_i32_0 : i32, i32
  }
  func.func @transform_4(%arg0: i32) -> (i32, i32) {
    %c0_i32 = arith.constant 0 : i32
    %c0_i32_0 = arith.constant 0 : i32
    %c0_i32_1 = arith.constant 0 : i32
    return %c0_i32, %c0_i32_0 : i32, i32
  }
  func.func @transform_5(%arg0: i32) -> (i32, i32, i32) {
    %c0_i32 = arith.constant 0 : i32
    %c0_i32_0 = arith.constant 0 : i32
    %c0_i32_1 = arith.constant 0 : i32
    return %arg0, %c0_i32, %c0_i32_0 : i32, i32, i32
  }
}

</mosaic_0001>

<bundles_post_ra>
// kernel: forward.1
= control target key start
LH: loop header
LB: loop body
LE: loop exit
PB: predicated region body
PF: predicated region fallthrough
CT: control target
= control target key end

     0   :  { %s972_s18 = smov 0   ;;  %s1176_s0 = inlined_call_operand.vmem [shape: bf16[128,128], index: 0, kind: input, shape index: {}]   ;;  %s1177_s1 = inlined_call_operand.vmem [shape: f32[16,9,4], index: 1, kind: input, shape index: {}]   ;;  %s1178_s2 = inlined_call_operand.vmem [shape: bf16[128,128], index: 2, kind: input, shape index: {}]   ;;  %s1179_s3 = inlined_call_operand.vmem [shape: bf16[128,128], index: 3, kind: input, shape index: {}]   ;;  %s1180_s4 = inlined_call_operand.vmem [shape: f32[1,128], index: 4, kind: input, shape index: {}]   ;;  %s1181_s5 = inlined_call_operand.vmem [shape: f32[16,16,128], index: 5, kind: output, shape index: {}]  }
   0x1 LB: > { %s764_s19 = sadd.s32 4294967295, %s939_s18   ;;  %p768_p0 = scmp.ge.s32.totalorder %s939_s18, 1  ;;  %s939_s18 = sphi %s972_s18, %s15_s18  }
   0x2   : > { %p189_p1 = scmp.lt.s32.totalorder %s939_s18, 3 }
   0x4   : > { %p190_p2 = pnand %p768_p0, %p189_p1 }
   0x5   : > { %s769_s20 = sshll.u32 (!%p190_p2), %s764_s19, 3 }
   0x6   : > { %193 = sbr.rel (%p190_p2) target bundleno = 431 (0x1af), region = 40  ;;  %p220_p3 = scmp.lt.s32.totalorder (!%p190_p2), %s769_s20, 15 }
   0xb   : > { %v941_v0 = vmov 0.0   ;;  %s1183_s20 = smov (!%p220_p3, %s769_s20), 15  ;;  %vm265_vm0 = vcmask 31744   ;;  %vm267_vm1 = vcmask 24576   ;;  %v875_v41 = vld [vmem:[%s1176_s0] sm:$0xff]  ;;  %v881_v42 = vld [vmem:[%s1176_s0 + $0x30] sm:$0xff] }
   0xc   : > { %247 = vst [vmem:[#allocation2 + $0x70] sm:$0xff] %v941_v0  ;;  %s873_s21 = sshll.u32 %s1183_s20, 4  ;;  %v876_v43 = vld [vmem:[%s1176_s0 + $0x8] sm:$0xff]  ;;  %v882_v44 = vld [vmem:[%s1176_s0 + $0x38] sm:$0xff]  ;;  %v877_v45 = vld [vmem:[%s1176_s0 + $0x10] sm:$0xff] }
   0xd   : > { %248 = vst [vmem:[#allocation2 + $0x78] sm:$0xff] %v941_v0  ;;  %s988_s24 = scalar_lea.vmem %s1177_s1, %s873_s21  ;;  %v878_v46 = vld [vmem:[%s1176_s0 + $0x18] sm:$0xff]  ;;  %v897_v49 = vld [vmem:[%s1179_s3 + $0x30] sm:$0xff]  ;;  %v896_v51 = vld [vmem:[%s1179_s3 + $0x28] sm:$0xff]  ;;  %s1140_s8 = scalar_lea.vmem %s1181_s5, %s873_s21 }
   0xe   : > { %233 = vst [vmem:[#allocation2] sm:$0xff] %v941_v0  ;;  %v263_v1 = vld [vmem:[%s988_s24 + $0x70] sm:$0xff]  ;;  %v264_v2 = vld [vmem:[%s988_s24 + $0x78] sm:$0x1]  ;;  %v261_v5 = vld [vmem:[%s988_s24 + $0x60] sm:$0xff] }
   0xf   : > { %234 = vst [vmem:[#allocation2 + $0x8] sm:$0xff] %v941_v0  ;;  %v262_v7 = vld [vmem:[%s988_s24 + $0x68] sm:$0x1]  ;;  %v259_v8 = vld [vmem:[%s988_s24 + $0x50] sm:$0xff]  ;;  %v260_v9 = vld [vmem:[%s988_s24 + $0x58] sm:$0x1] }
  0x10   : > { %235 = vst [vmem:[#allocation2 + $0x10] sm:$0xff] %v941_v0  ;;  %v257_v10 = vld [vmem:[%s988_s24 + $0x40] sm:$0xff]  ;;  %v258_v11 = vld [vmem:[%s988_s24 + $0x48] sm:$0x1]  ;;  %v255_v12 = vld [vmem:[%s988_s24 + $0x30] sm:$0xff] }
  0x11   : > { %236 = vst [vmem:[#allocation2 + $0x18] sm:$0xff] %v941_v0  ;;  %v256_v13 = vld [vmem:[%s988_s24 + $0x38] sm:$0x1]  ;;  %v253_v14 = vld [vmem:[%s988_s24 + $0x20] sm:$0xff]  ;;  %v254_v15 = vld [vmem:[%s988_s24 + $0x28] sm:$0x1] }
  0x12   : > { %237 = vst [vmem:[#allocation2 + $0x20] sm:$0xff] %v941_v0  ;;  %v251_v17 = vld [vmem:[%s988_s24 + $0x10] sm:$0xff]  ;;  %v252_v19 = vld [vmem:[%s988_s24 + $0x18] sm:$0x1]  ;;  %v249_v22 = vld [vmem:[%s988_s24] sm:$0xff] }
  0x13   : > { %281 = vst.msk [vmem:[#allocation2 + $0x70] sm:$0xff] %vm265_vm0, %v263_v1  ;;  %v250_v24 = vld [vmem:[%s988_s24 + $0x8] sm:$0x1]  ;;  %v898_v47 = vld [vmem:[%s1179_s3 + $0x38] sm:$0xff]  ;;  %v889_v50 = vld [vmem:[%s1178_s2 + $0x30] sm:$0xff] }
  0x14   : > { %282 = vst.msk [vmem:[#allocation2 + $0x78] sm:$0x1] %vm267_vm1, %v264_v2  ;;  %v890_v48 = vld [vmem:[%s1178_s2 + $0x38] sm:$0xff]  ;;  %508 = vmatpush.bf16.msra.mxu1 %v898_v47  ;;  %v888_v52 = vld [vmem:[%s1178_s2 + $0x28] sm:$0xff]  ;;  %v895_v53 = vld [vmem:[%s1179_s3 + $0x20] sm:$0xff] }
  0x15   : > { %238 = vst [vmem:[#allocation2 + $0x28] sm:$0xff] %v941_v0  ;;  %605 = vmatpush.bf16.msra.mxu2 %v890_v48  ;;  %v887_v54 = vld [vmem:[%s1178_s2 + $0x20] sm:$0xff]  ;;  %v894_v56 = vld [vmem:[%s1179_s3 + $0x18] sm:$0xff]  ;;  %v893_v58 = vld [vmem:[%s1179_s3 + $0x10] sm:$0xff] }
  0x16   : > { %239 = vst [vmem:[#allocation2 + $0x30] sm:$0xff] %v941_v0  ;;  %v879_v55 = vld [vmem:[%s1176_s0 + $0x20] sm:$0xff]  ;;  %v886_v57 = vld [vmem:[%s1178_s2 + $0x18] sm:$0xff]  ;;  %v892_v59 = vld [vmem:[%s1179_s3 + $0x8] sm:$0xff] }
  0x17   : > { %240 = vst [vmem:[#allocation2 + $0x38] sm:$0xff] %v941_v0  ;;  %v880_v60 = vld [vmem:[%s1176_s0 + $0x28] sm:$0xff]  ;;  %v891_v61 = vld [vmem:[%s1179_s3] sm:$0xff]  ;;  %v885_v62 = vld [vmem:[%s1178_s2 + $0x10] sm:$0xff] }
  0x18   : > { %241 = vst [vmem:[#allocation2 + $0x40] sm:$0xff] %v941_v0  ;;  %509 = vmatpush.bf16.msra.mxu1 %v897_v49  ;;  %v884_v63 = vld [vmem:[%s1178_s2 + $0x8] sm:$0xff] }
  0x19   : > { %242 = vst [vmem:[#allocation2 + $0x48] sm:$0xff] %v941_v0  ;;  %606 = vmatpush.bf16.msra.mxu2 %v889_v50 }
  0x1a   : > { %v297_v3 = vld [vmem:[#allocation2 + $0x70] sm:$0xff]  ;;  %243 = vst [vmem:[#allocation2 + $0x50] sm:$0xff] %v941_v0 }
  0x1b   : > { %v298_v4 = vld [vmem:[#allocation2 + $0x78] sm:$0xff]  ;;  %244 = vst [vmem:[#allocation2 + $0x58] sm:$0xff] %v941_v0 }
  0x1c   : > { %v995_v6 = vpack.c.bf16 %v298_v4, %v297_v3  ;;  %245 = vst [vmem:[#allocation2 + $0x60] sm:$0xff] %v941_v0  ;;  %510 = vmatpush.bf16.msra.mxu1 %v896_v51 }
  0x1d   : > { %246 = vst [vmem:[#allocation2 + $0x68] sm:$0xff] %v941_v0  ;;  %607 = vmatpush.bf16.msra.mxu2 %v888_v52  ;;  %v883_v0 = vld [vmem:[%s1178_s2] sm:$0xff] }
  0x1e   : > { %371 = vmatpush.bf16.msra.mxu0 %v995_v6  ;;  %279 = vst.msk [vmem:[#allocation2 + $0x60] sm:$0xff] %vm265_vm0, %v261_v5  ;;  %899 = vmatpush.bf16.msra.mxu3 %v995_v6 }
  0x1f   : > { %280 = vst.msk [vmem:[#allocation2 + $0x68] sm:$0x1] %vm267_vm1, %v262_v7 }
  0x20   : > { %277 = vst.msk [vmem:[#allocation2 + $0x50] sm:$0xff] %vm265_vm0, %v259_v8  ;;  %511 = vmatpush.bf16.msra.mxu1 %v895_v53 }
  0x21   : > { %278 = vst.msk [vmem:[#allocation2 + $0x58] sm:$0x1] %vm267_vm1, %v260_v9  ;;  %608 = vmatpush.bf16.msra.mxu2 %v887_v54 }
  0x22   : > { %275 = vst.msk [vmem:[#allocation2 + $0x40] sm:$0xff] %vm265_vm0, %v257_v10 }
  0x23   : > { %276 = vst.msk [vmem:[#allocation2 + $0x48] sm:$0x1] %vm267_vm1, %v258_v11 }
  0x24   : > { %273 = vst.msk [vmem:[#allocation2 + $0x30] sm:$0xff] %vm265_vm0, %v255_v12  ;;  %512 = vmatpush.bf16.msra.mxu1 %v894_v56 }
  0x25   : > { %v295_v16 = vld [vmem:[#allocation2 + $0x60] sm:$0xff]  ;;  %274 = vst.msk [vmem:[#allocation2 + $0x38] sm:$0x1] %vm267_vm1, %v256_v13  ;;  %609 = vmatpush.bf16.msra.mxu2 %v886_v57 }
  0x26   : > { %v296_v18 = vld [vmem:[#allocation2 + $0x68] sm:$0xff]  ;;  %271 = vst.msk [vmem:[#allocation2 + $0x20] sm:$0xff] %vm265_vm0, %v253_v14 }
  0x27   : > { %v1019_v20 = vpack.c.bf16 %v296_v18, %v295_v16  ;;  %v293_v21 = vld [vmem:[#allocation2 + $0x50] sm:$0xff]  ;;  %272 = vst.msk [vmem:[#allocation2 + $0x28] sm:$0x1] %vm267_vm1, %v254_v15 }
  0x28   : > { %v294_v23 = vld [vmem:[#allocation2 + $0x58] sm:$0xff]  ;;  %269 = vst.msk [vmem:[#allocation2 + $0x10] sm:$0xff] %vm265_vm0, %v251_v17  ;;  %513 = vmatpush.bf16.msra.mxu1 %v893_v58 }
  0x29   : > { %372 = vmatpush.bf16.msra.mxu0 %v1019_v20  ;;  %v1026_v25 = vpack.c.bf16 %v294_v23, %v293_v21  ;;  %900 = vmatpush.bf16.msra.mxu3 %v1019_v20  ;;  %270 = vst.msk [vmem:[#allocation2 + $0x18] sm:$0x1] %vm267_vm1, %v252_v19  ;;  %v291_v26 = vld [vmem:[#allocation2 + $0x40] sm:$0xff] }
  0x2a   : > { %v292_v27 = vld [vmem:[#allocation2 + $0x48] sm:$0xff]  ;;  %266 = vst.msk [vmem:[#allocation2] sm:$0xff] %vm265_vm0, %v249_v22  ;;  %610 = vmatpush.bf16.msra.mxu2 %v885_v62 }
  0x2b   : > { %268 = vst.msk [vmem:[#allocation2 + $0x8] sm:$0x1] %vm267_vm1, %v250_v24  ;;  %v1033_v28 = vpack.c.bf16 %v292_v27, %v291_v26  ;;  %v289_v29 = vld [vmem:[#allocation2 + $0x30] sm:$0xff] }
  0x2c   : > { %v290_v30 = vld [vmem:[#allocation2 + $0x38] sm:$0xff]  ;;  %514 = vmatpush.bf16.msra.mxu1 %v892_v59 }
  0x2d   : > { %373 = vmatpush.bf16.msra.mxu0 %v1026_v25  ;;  %901 = vmatpush.bf16.msra.mxu3 %v1026_v25  ;;  %v1037_v31 = vpack.c.bf16 %v290_v30, %v289_v29  ;;  %v287_v32 = vld [vmem:[#allocation2 + $0x20] sm:$0xff] }
  0x2e   : > { %v288_v33 = vld [vmem:[#allocation2 + $0x28] sm:$0xff]  ;;  %611 = vmatpush.bf16.msra.mxu2 %v884_v63 }
  0x2f   : > { %v1041_v34 = vpack.c.bf16 %v288_v33, %v287_v32  ;;  %v285_v35 = vld [vmem:[#allocation2 + $0x10] sm:$0xff] }
  0x30   : > { %v286_v36 = vld [vmem:[#allocation2 + $0x18] sm:$0xff]  ;;  %515 = vmatpush.bf16.msra.mxu1 %v891_v61 }
  0x31   : > { %374 = vmatpush.bf16.msra.mxu0 %v1033_v28  ;;  %902 = vmatpush.bf16.msra.mxu3 %v1033_v28  ;;  %v1045_v37 = vpack.c.bf16 %v286_v36, %v285_v35  ;;  %v283_v38 = vld [vmem:[#allocation2] sm:$0xff] }
  0x32   : > { %v284_v39 = vld [vmem:[#allocation2 + $0x8] sm:$0xff]  ;;  %612 = vmatpush.bf16.msra.mxu2 %v883_v0 }
  0x33   : > { %v299_v40 = vpack.c.bf16 %v284_v39, %v283_v38 }
  0x35   : > { %375 = vmatpush.bf16.msra.mxu0 %v1037_v31  ;;  %903 = vmatpush.bf16.msra.mxu3 %v1037_v31 }
  0x36   : > { %516 = vmatmul.bf16.vlgmr.msra.gmra.mxu1 %v299_v40 }
  0x39   : > { %376 = vmatpush.bf16.msra.mxu0 %v1041_v34  ;;  %904 = vmatpush.bf16.msra.mxu3 %v1041_v34 }
  0x3d   : > { %377 = vmatpush.bf16.msra.mxu0 %v1045_v37  ;;  %905 = vmatpush.bf16.msra.mxu3 %v1045_v37 }
  0x41   : > { %378 = vmatpush.bf16.msra.mxu0 %v299_v40  ;;  %906 = vmatpush.bf16.msra.mxu3 %v299_v40 }
  0x44   : > { %379 = vmatmul.bf16.vlgmr.msra.gmra.mxu0 %v875_v41  ;;  %409 = vmatmul.bf16.vlgmr.msra.gmra.mxu3 %v881_v42 }
  0x45   : > { %907 = vmatpush.bf16.msrb.mxu3 %v898_v47 }
  0x46   : > { %521 = vmatmul.bf16.gmra.mxu1 %v1045_v37 }
  0x49   : > { %908 = vmatpush.bf16.msrb.mxu3 %v897_v49 }
  0x4d   : > { %909 = vmatpush.bf16.msrb.mxu3 %v896_v51 }
  0x51   : > { %910 = vmatpush.bf16.msrb.mxu3 %v895_v53 }
  0x54   : > { %384 = vmatmul.bf16.gmra.mxu0 %v876_v43  ;;  %414 = vmatmul.bf16.gmra.mxu3 %v882_v44 }
  0x55   : > { %911 = vmatpush.bf16.msrb.mxu3 %v894_v56 }
  0x56   : > { %526 = vmatmul.bf16.gmra.mxu1 %v1041_v34 }
  0x59   : > { %912 = vmatpush.bf16.msrb.mxu3 %v893_v58 }
  0x5d   : > { %913 = vmatpush.bf16.msrb.mxu3 %v892_v59 }
  0x61   : > { %914 = vmatpush.bf16.msrb.mxu3 %v891_v61 }
  0x64   : > { %389 = vmatmul.bf16.gmra.mxu0 %v877_v45  ;;  %546 = vmatmul.bf16.vlgmr.msrb.gmra.mxu3 %v1019_v20 }
  0x65   : > { %915 = vmatpush.bf16.msra.mxu3 %v890_v48 }
  0x66   : > { %531 = vmatmul.bf16.gmra.mxu1 %v1037_v31 }
  0x69   : > { %916 = vmatpush.bf16.msra.mxu3 %v889_v50 }
  0x6d   : > { %917 = vmatpush.bf16.msra.mxu3 %v888_v52 }
  0x71   : > { %918 = vmatpush.bf16.msra.mxu3 %v887_v54 }
  0x74   : > { %394 = vmatmul.bf16.gmra.mxu0 %v878_v46  ;;  %551 = vmatmul.bf16.gmra.mxu3 %v995_v6 }
  0x75   : > { %919 = vmatpush.bf16.msra.mxu3 %v886_v57 }
  0x76   : > { %536 = vmatmul.bf16.gmra.mxu1 %v1033_v28 }
  0x79   : > { %920 = vmatpush.bf16.msra.mxu3 %v885_v62 }
  0x7d   : > { %921 = vmatpush.bf16.msra.mxu3 %v884_v63 }
  0x81   : > { %922 = vmatpush.bf16.msra.mxu3 %v883_v0 }
  0x84   : > { %399 = vmatmul.bf16.gmra.mxu0 %v879_v55 }
  0x86   : > { %541 = vmatmul.bf16.gmra.mxu1 %v1026_v25  ;;  %v1132_v25 = vld [vmem:[%s1180_s4] ss:$0 sm:$0xff] }
  0x94   : > { %404 = vmatmul.bf16.gmra.mxu0 %v880_v60 }
  0xb3   : > { %v517_v28 = vpop.f32.mrf.mxu1 }
  0xbb   : > { %v519_v30 = vpop.f32.mrf.mxu1 }
  0xc1   : > { %v380_v1 = vpop.f32.mrf.mxu0 }
  0xc3   : > { %v522_v32 = vpop.f32.mrf.mxu1 }
  0xc7   : > { %v410_v2 = vpop.f32.mrf.mxu3 }
  0xc9   : > { %v382_v3 = vpop.f32.mrf.mxu0 }
  0xca   : > { %v420_v4 = vpack.c.bf16 %v382_v3, %v380_v1 }
  0xcb   : > { %v524_v40 = vpop.f32.mrf.mxu1 }
  0xcc   : > { %613 = vmatmul.bf16.vlgmr.msra.gmra.mxu2 %v420_v4 }
  0xcf   : > { %v412_v5 = vpop.f32.mrf.mxu3 }
  0xd0   : > { %v426_v7 = vpack.c.bf16 %v412_v5, %v410_v2 }
  0xd1   : > { %v385_v8 = vpop.f32.mrf.mxu0 }
  0xd2   : > { %643 = vmatmul.bf16.vlgmr.msra.gmra.mxu3 %v426_v7 }
  0xd3   : > { %v527_v51 = vpop.f32.mrf.mxu1 }
  0xd7   : > { %v415_v9 = vpop.f32.mrf.mxu3 }
  0xd9   : > { %v387_v6 = vpop.f32.mrf.mxu0 }
  0xda   : > { %v421_v10 = vpack.c.bf16 %v387_v6, %v385_v8 }
  0xdb   : > { %v529_v62 = vpop.f32.mrf.mxu1 }
  0xdc   : > { %618 = vmatmul.bf16.gmra.mxu2 %v421_v10 }
  0xdf   : > { %v417_v11 = vpop.f32.mrf.mxu3 }
  0xe0   : > { %v427_v12 = vpack.c.bf16 %v417_v11, %v415_v9 }
  0xe1   : > { %v390_v13 = vpop.f32.mrf.mxu0 }
  0xe2   : > { %648 = vmatmul.bf16.gmra.mxu3 %v427_v12 }
  0xe3   : > { %v532_v9 = vpop.f32.mrf.mxu1 }
  0xe7   : > { %v547_v26 = vpop.f32.mrf.mxu3 }
  0xe9   : > { %v392_v14 = vpop.f32.mrf.mxu0 }
  0xea   : > { %v422_v15 = vpack.c.bf16 %v392_v14, %v390_v13 }
  0xeb   : > { %v534_v13 = vpop.f32.mrf.mxu1 }
  0xec   : > { %623 = vmatmul.bf16.gmra.mxu2 %v422_v15 }
  0xef   : > { %v549_v27 = vpop.f32.mrf.mxu3 }
  0xf1   : > { %v395_v16 = vpop.f32.mrf.mxu0 }
  0xf7   : > { %v552_v29 = vpop.f32.mrf.mxu3 }
  0xf9   : > { %v397_v17 = vpop.f32.mrf.mxu0 }
  0xfa   : > { %v423_v18 = vpack.c.bf16 %v397_v17, %v395_v16 }
  0xfc   : > { %628 = vmatmul.bf16.gmra.mxu2 %v423_v18 }
  0xff   : > { %v554_v31 = vpop.f32.mrf.mxu3 }
 0x101   : > { %v400_v19 = vpop.f32.mrf.mxu0 }
 0x109   : > { %v402_v20 = vpop.f32.mrf.mxu0 }
 0x10a   : > { %v424_v21 = vpack.c.bf16 %v402_v20, %v400_v19  ;;  %v537_v20 = vpop.f32.mrf.mxu1 }
 0x10c   : > { %633 = vmatmul.bf16.gmra.mxu2 %v424_v21 }
 0x111   : > { %v405_v22 = vpop.f32.mrf.mxu0 }
 0x119   : > { %v407_v23 = vpop.f32.mrf.mxu0 }
 0x11a   : > { %v425_v24 = vpack.c.bf16 %v407_v23, %v405_v22 }
 0x11c   : > { %638 = vmatmul.bf16.gmra.mxu2 %v425_v24 }
 0x14f   : > { %v614_v33 = vpop.f32.mrf.mxu2 }
 0x150   : > { %v615_v34 = vadd.f32 %v614_v33, %v517_v28 }
 0x152   : > { %v658_v35 = vadd.f32 %v1132_v25, %v615_v34 }
 0x154   : > { %v674_v36 = vmax.f32 %v658_v35, 0.0 }
 0x155   : > { %v644_v37 = vpop.f32.mrf.mxu3 }
 0x156   : > { %690 = vst [vmem:[%s1140_s8] sm:$0xff] %v674_v36  ;;  %v645_v38 = vadd.f32 %v644_v37, %v547_v26 }
 0x157   : > { %v616_v39 = vpop.f32.mrf.mxu2 }
 0x158   : > { %v617_v41 = vadd.f32 %v616_v39, %v519_v30  ;;  %v670_v42 = vadd.f32 %v1132_v25, %v645_v38 }
 0x15a   : > { %v659_v43 = vadd.f32 %v1132_v25, %v617_v41  ;;  %v686_v44 = vmax.f32 %v670_v42, 0.0 }
 0x15c   : > { %v675_v45 = vmax.f32 %v659_v43, 0.0  ;;  %702 = vst [vmem:[%s1140_s8 + $0x60] sm:$0xff] %v686_v44 }
 0x15d   : > { %v646_v46 = vpop.f32.mrf.mxu3 }
 0x15e   : > { %691 = vst [vmem:[%s1140_s8 + $0x8] sm:$0xff] %v675_v45  ;;  %v647_v47 = vadd.f32 %v646_v46, %v549_v27  ;;  %v539_v27 = vpop.f32.mrf.mxu1 }
 0x15f   : > { %v619_v48 = vpop.f32.mrf.mxu2 }
 0x160   : > { %v620_v49 = vadd.f32 %v619_v48, %v522_v32  ;;  %v671_v50 = vadd.f32 %v1132_v25, %v647_v47 }
 0x162   : > { %v660_v52 = vadd.f32 %v1132_v25, %v620_v49  ;;  %v687_v53 = vmax.f32 %v671_v50, 0.0 }
 0x164   : > { %v676_v54 = vmax.f32 %v660_v52, 0.0  ;;  %703 = vst [vmem:[%s1140_s8 + $0x68] sm:$0xff] %v687_v53 }
 0x165   : > { %v649_v55 = vpop.f32.mrf.mxu3 }
 0x166   : > { %692 = vst [vmem:[%s1140_s8 + $0x10] sm:$0xff] %v676_v54  ;;  %v650_v56 = vadd.f32 %v649_v55, %v552_v29  ;;  %v542_v33 = vpop.f32.mrf.mxu1 }
 0x167   : > { %v621_v57 = vpop.f32.mrf.mxu2 }
 0x168   : > { %v622_v58 = vadd.f32 %v621_v57, %v524_v40  ;;  %v672_v59 = vadd.f32 %v1132_v25, %v650_v56 }
 0x16a   : > { %v661_v60 = vadd.f32 %v1132_v25, %v622_v58  ;;  %v688_v61 = vmax.f32 %v672_v59, 0.0 }
 0x16c   : > { %v677_v63 = vmax.f32 %v661_v60, 0.0  ;;  %704 = vst [vmem:[%s1140_s8 + $0x70] sm:$0xff] %v688_v61 }
 0x16d   : > { %v651_v0 = vpop.f32.mrf.mxu3 }
 0x16e   : > { %693 = vst [vmem:[%s1140_s8 + $0x18] sm:$0xff] %v677_v63  ;;  %v652_v1 = vadd.f32 %v651_v0, %v554_v31  ;;  %v544_v38 = vpop.f32.mrf.mxu1 }
 0x16f   : > { %v624_v2 = vpop.f32.mrf.mxu2 }
 0x170   : > { %v625_v3 = vadd.f32 %v624_v2, %v527_v51  ;;  %v673_v4 = vadd.f32 %v1132_v25, %v652_v1 }
 0x172   : > { %v662_v5 = vadd.f32 %v1132_v25, %v625_v3  ;;  %v689_v7 = vmax.f32 %v673_v4, 0.0 }
 0x174   : > { %v678_v8 = vmax.f32 %v662_v5, 0.0  ;;  %705 = vst [vmem:[%s1140_s8 + $0x78] sm:$0xff] %v689_v7 }
 0x176   : > { %694 = vst [vmem:[%s1140_s8 + $0x20] sm:$0xff] %v678_v8 }
 0x177   : > { %v626_v6 = vpop.f32.mrf.mxu2 }
 0x178   : > { %v627_v10 = vadd.f32 %v626_v6, %v529_v62 }
 0x17a   : > { %v663_v11 = vadd.f32 %v1132_v25, %v627_v10 }
 0x17c   : > { %v679_v12 = vmax.f32 %v663_v11, 0.0 }
 0x17e   : > { %695 = vst [vmem:[%s1140_s8 + $0x28] sm:$0xff] %v679_v12 }
 0x17f   : > { %v629_v14 = vpop.f32.mrf.mxu2 }
 0x180   : > { %v630_v15 = vadd.f32 %v629_v14, %v532_v9 }
 0x182   : > { %v664_v16 = vadd.f32 %v1132_v25, %v630_v15 }
 0x184   : > { %v680_v17 = vmax.f32 %v664_v16, 0.0 }
 0x186   : > { %696 = vst [vmem:[%s1140_s8 + $0x30] sm:$0xff] %v680_v17 }
 0x187   : > { %v631_v18 = vpop.f32.mrf.mxu2 }
 0x188   : > { %v632_v19 = vadd.f32 %v631_v18, %v534_v13 }
 0x18a   : > { %v665_v21 = vadd.f32 %v1132_v25, %v632_v19 }
 0x18c   : > { %v681_v22 = vmax.f32 %v665_v21, 0.0 }
 0x18e   : > { %697 = vst [vmem:[%s1140_s8 + $0x38] sm:$0xff] %v681_v22 }
 0x18f   : > { %v634_v23 = vpop.f32.mrf.mxu2 }
 0x190   : > { %v635_v24 = vadd.f32 %v634_v23, %v537_v20 }
 0x192   : > { %v666_v26 = vadd.f32 %v1132_v25, %v635_v24 }
 0x194   : > { %v682_v28 = vmax.f32 %v666_v26, 0.0 }
 0x196   : > { %698 = vst [vmem:[%s1140_s8 + $0x40] sm:$0xff] %v682_v28 }
 0x197   : > { %v636_v29 = vpop.f32.mrf.mxu2 }
 0x198   : > { %v637_v30 = vadd.f32 %v636_v29, %v539_v27 }
 0x19a   : > { %v667_v31 = vadd.f32 %v1132_v25, %v637_v30 }
 0x19c   : > { %v683_v32 = vmax.f32 %v667_v31, 0.0 }
 0x19e   : > { %699 = vst [vmem:[%s1140_s8 + $0x48] sm:$0xff] %v683_v32 }
 0x19f   : > { %v639_v34 = vpop.f32.mrf.mxu2 }
 0x1a0   : > { %v640_v35 = vadd.f32 %v639_v34, %v542_v33 }
 0x1a2   : > { %v668_v36 = vadd.f32 %v1132_v25, %v640_v35 }
 0x1a4   : > { %v684_v37 = vmax.f32 %v668_v36, 0.0 }
 0x1a6   : > { %700 = vst [vmem:[%s1140_s8 + $0x50] sm:$0xff] %v684_v37 }
 0x1a7   : > { %v641_v39 = vpop.f32.mrf.mxu2 }
 0x1a8   : > { %v642_v40 = vadd.f32 %v641_v39, %v544_v38 }
 0x1aa   : > { %v669_v41 = vadd.f32 %v1132_v25, %v642_v40 }
 0x1ac   : > { %v685_v42 = vmax.f32 %v669_v41, 0.0 }
 0x1ae   : > { %701 = vst [vmem:[%s1140_s8 + $0x58] sm:$0xff] %v685_v42 }
 0x1af PF: > { %s15_s18 = sadd.s32 1, %s939_s18  }
 0x1b0   : > { %p12_p4 = scmp.ge.s32.totalorder %s15_s18, 4  }
 0x1b2   :  { %14 = sbr.rel (!%p12_p4) target bundleno = 1 (0x1), region = 70 }

</bundles_post_ra>
